<compile_context>
chip_gen: v6e
topology: v6e:2x2x1
jax: 0.10.0
libtpu: 0.0.40
codegen_flags: <defaults>
</compile_context>

<pallas_src>
import math

import jax
import jax.numpy as jnp
from jax.experimental import pallas as pl
from jax.experimental.pallas import tpu as pltpu


_LANE = 128
_MAX_BLOCK_BYTES = 2 * 1024 * 1024   # ~2 MiB blocks: roofline-ish, v7x-safe
_FAST_PATH_BYTES = 1 << 20           # below this, skip pallas_call entirely


def _round_down(x, m):
    return (x // m) * m


def _sublane(itemsize):
    # Sublane packing multiple: 8 rows for 32-bit, 16 for 16-bit, 32 for 8-bit.
    return {1: 32, 2: 16, 4: 8}.get(itemsize, 8)


def _boundary_interp_kernel(steps_ref, z_ref, b_ref, o_ref):
    # steps_ref: (1,) float32 scalar in SMEM
    # z_ref:     (TB, TF) latent tile
    # b_ref:     (1, TF)  boundary tile (batch-invariant -> stays VMEM-resident
    #            across the inner batch grid axis)
    # o_ref:     (TB, TF)
    s = steps_ref[0]
    o_ref[...] = (z_ref[...].astype(jnp.float32)
                  - s * b_ref[...].astype(jnp.float32)).astype(o_ref.dtype)


def boundary_interpolation_forward(z, boundary, steps, *,
                                   min_pallas_bytes=_FAST_PATH_BYTES):
    """out = z - steps * boundary (boundary broadcast over the batch dim).

    z:        (N, *shape)
    boundary: (*shape)        -- the module's registered buffer
    steps:    python / JAX scalar
    """
    N = z.shape[0]
    assert z.shape[1:] == boundary.shape, "boundary must match z's trailing dims"
    F = math.prod(boundary.shape)
    itemsize = jnp.dtype(z.dtype).itemsize
    steps_f32 = jnp.asarray(steps, dtype=jnp.float32)

    # --- small-input fast path: pallas_call fixed overhead would dominate ---
    if N * F * itemsize < min_pallas_bytes:
        out = z.astype(jnp.float32) - steps_f32 * boundary.astype(jnp.float32)[None]
        return out.astype(z.dtype)

    z2 = z.reshape(N, F)
    b2 = boundary.reshape(1, F).astype(z.dtype)
    steps_arr = steps_f32.reshape(1)

    SUBLANE = _sublane(itemsize)

    # --- feature tile: 128-lane multiple (or full extent), never exceeding F --
    tb_min = min(N, SUBLANE)
    tf_cap = max(_LANE, _round_down(_MAX_BLOCK_BYTES // (tb_min * itemsize), _LANE))
    if F < _LANE:
        TF = F                                    # full-extent tiny feature dim
    elif F % _LANE == 0:
        TF = min(F, tf_cap)                       # unmasked full-width stores
    else:
        TF = min(_round_down(F, _LANE), tf_cap)   # tail handled by ragged grid

    # --- batch tile: sublane-aligned (or full batch), never exceeding N ------
    if N <= SUBLANE:
        TB = N
    else:
        TB = _round_down(_MAX_BLOCK_BYTES // (TF * itemsize), SUBLANE)
        TB = max(SUBLANE, min(TB, _round_down(N, SUBLANE)))

    n_f = pl.cdiv(F, TF)
    n_b = pl.cdiv(N, TB)

    steps_spec = pl.BlockSpec(memory_space=pltpu.MemorySpace.SMEM)

    if n_f == 1:
        # Single feature tile: 1-D grid over the batch so the lone parallel
        # axis is the one megacore (v7x) shards across both TensorCores.
        grid = (n_b,)
        in_specs = [
            steps_spec,
            pl.BlockSpec((TB, TF), lambda n: (n, 0)),
            pl.BlockSpec((1, TF), lambda n: (0, 0)),
        ]
        out_specs = pl.BlockSpec((TB, TF), lambda n: (n, 0))
        dim_sem = ("parallel",)
    else:
        # Feature tiles outer, batch inner -> boundary tile stays VMEM-resident
        # across the inner batch loop (no redundant DMA of the buffer).
        grid = (n_f, n_b)
        in_specs = [
            steps_spec,
            pl.BlockSpec((TB, TF), lambda f, n: (n, f)),
            pl.BlockSpec((1, TF), lambda f, n: (0, f)),
        ]
        out_specs = pl.BlockSpec((TB, TF), lambda f, n: (n, f))
        dim_sem = ("parallel", "parallel")

    out = pl.pallas_call(
        _boundary_interp_kernel,
        out_shape=jax.ShapeDtypeStruct((N, F), z.dtype),
        grid_spec=pltpu.PrefetchScalarGridSpec(
            num_scalar_prefetch=0,
            grid=grid,
            in_specs=in_specs,
            out_specs=out_specs,
        ),
        compiler_params=pltpu.CompilerParams(
            dimension_semantics=dim_sem,
            vmem_limit_bytes=32 * 1024 * 1024,
        ),
    )(steps_arr, z2, b2)

    return out.reshape(z.shape)


if __name__ == "__main__":
    key = jax.random.PRNGKey(0)
    k1, k2, k3, k4, k5, k6 = jax.random.split(key, 6)

    # 1) The module's nominal small case, forced through the Pallas kernel.
    N, C, H, W = 2, 4, 16, 16
    z = jax.random.normal(k1, (N, C, H, W), dtype=jnp.float32)
    boundary = jax.random.normal(k2, (C, H, W), dtype=jnp.float32)
    steps = 0.7
    out = boundary_interpolation_forward(z, boundary, steps, min_pallas_bytes=0)
    out = jax.block_until_ready(out)
    ref = z - steps * boundary[None]
    assert out.shape == z.shape and out.dtype == z.dtype
    assert jnp.allclose(out, ref, atol=1e-6, rtol=1e-6), "mismatch (small case)"

    # 2) Ragged case: N not a multiple of 8, F not a multiple of 128.
    N2, C2, H2, W2 = 10, 3, 17, 19   # F = 969
    z2 = jax.random.normal(k3, (N2, C2, H2, W2), dtype=jnp.float32)
    b2 = jax.random.normal(k4, (C2, H2, W2), dtype=jnp.float32)
    out2 = boundary_interpolation_forward(z2, b2, 1.25, min_pallas_bytes=0)
    out2 = jax.block_until_ready(out2)
    ref2 = z2 - 1.25 * b2[None]
    assert jnp.allclose(out2, ref2, atol=1e-6, rtol=1e-6), "mismatch (ragged case)"

    # 3) Larger case exercising the 2-D (feature, batch) grid (F > one tile).
    N3, C3, H3, W3 = 8, 8, 128, 128  # F = 131072 -> two feature tiles
    z3 = jax.random.normal(k5, (N3, C3, H3, W3), dtype=jnp.float32)
    b3 = jax.random.normal(k6, (C3, H3, W3), dtype=jnp.float32)
    out3 = boundary_interpolation_forward(z3, b3, -0.3)
    out3 = jax.block_until_ready(out3)
    ref3 = z3 - (-0.3) * b3[None]
    assert jnp.allclose(out3, ref3, atol=1e-6, rtol=1e-6), "mismatch (tiled case)"

    print("KERNEL_OK")
</pallas_src>

<mosaic_0001>
module attributes {stable_mosaic.version = 11 : i64} {
  func.func @_boundary_interp_kernel(%arg0: i32, %arg1: memref<1xf32, #tpu.memory_space<smem>>, %arg2: memref<2x1024xf32, #tpu.memory_space<vmem>>, %arg3: memref<1x1024xf32, #tpu.memory_space<vmem>>, %arg4: memref<2x1024xf32, #tpu.memory_space<vmem>>) attributes {dimension_semantics = [#tpu.dimension_semantics<parallel>], iteration_bounds = array<i64: 1>, scalar_prefetch = 0 : i64, scratch_operands = 0 : i64, tpu.core_type = #tpu.core_type<tc>, window_params = [{transform_indices = @transform_0, window_bounds = array<i64: 1>}, {transform_indices = @transform_1, window_bounds = array<i64: 2, 1024>}, {pipeline_mode = #tpu.pipeline_mode<synchronous>, transform_indices = @transform_2, window_bounds = array<i64: 1, 1024>}, {transform_indices = @transform_3, window_bounds = array<i64: 2, 1024>}]} {
    %c0 = arith.constant 0 : index
    %0 = memref.load %arg1[%c0] : memref<1xf32, #tpu.memory_space<smem>>
    %c0_0 = arith.constant 0 : index
    %c0_1 = arith.constant 0 : index
    %1 = vector.load %arg2[%c0_0, %c0_1] : memref<2x1024xf32, #tpu.memory_space<vmem>>, vector<2x1024xf32>
    %c0_2 = arith.constant 0 : index
    %c0_3 = arith.constant 0 : index
    %2 = vector.load %arg3[%c0_2, %c0_3] : memref<1x1024xf32, #tpu.memory_space<vmem>>, vector<1x1024xf32>
    %3 = vector.broadcast %0 : f32 to vector<1x1024xf32>
    %4 = arith.mulf %3, %2 : vector<1x1024xf32>
    %5 = vector.broadcast %4 : vector<1x1024xf32> to vector<2x1024xf32>
    %6 = arith.subf %1, %5 : vector<2x1024xf32>
    %c0_4 = arith.constant 0 : index
    %c0_5 = arith.constant 0 : index
    %7 = vector.load %arg4[%c0_4, %c0_5] : memref<2x1024xf32, #tpu.memory_space<vmem>>, vector<2x1024xf32>
    tpu.vector_store %arg4[%c0_4, %c0_5], %6 {strides = array<i32>} : memref<2x1024xf32, #tpu.memory_space<vmem>>, vector<2x1024xf32>,
    return
  }
  func.func @transform_0(%arg0: i32) -> i32 {
    %c0_i32 = arith.constant 0 : i32
    %c0_i32_0 = arith.constant 0 : i32
    return %c0_i32 : i32
  }
  func.func @transform_1(%arg0: i32) -> (i32, i32) {
    %c0_i32 = arith.constant 0 : i32
    %c0_i32_0 = arith.constant 0 : i32
    return %arg0, %c0_i32 : i32, i32
  }
  func.func @transform_2(%arg0: i32) -> (i32, i32) {
    %c0_i32 = arith.constant 0 : i32
    %c0_i32_0 = arith.constant 0 : i32
    %c0_i32_1 = arith.constant 0 : i32
    return %c0_i32, %c0_i32_0 : i32, i32
  }
  func.func @transform_3(%arg0: i32) -> (i32, i32) {
    %c0_i32 = arith.constant 0 : i32
    %c0_i32_0 = arith.constant 0 : i32
    return %arg0, %c0_i32 : i32, i32
  }
}

</mosaic_0001>

<bundles_post_ra>
// kernel: tpu_custom_call.1
= control target key start
LH: loop header
LB: loop body
LE: loop exit
PB: predicated region body
PF: predicated region fallthrough
CT: control target
= control target key end

     0   :  { %9 = vsyncpa [#allocation4], 0  ;;  %s241_s0 = inlined_call_operand.<no memory space> [shape: f32[1], index: 0, kind: input, shape index: {}]   ;;  %s242_s1 = inlined_call_operand.hbm [shape: f32[2,1024], index: 1, kind: input, shape index: {}]   ;;  %s243_s2 = inlined_call_operand.hbm [shape: f32[1,1024], index: 2, kind: input, shape index: {}]   ;;  %s244_s3 = inlined_call_operand.hbm [shape: f32[2,1024], index: 3, kind: output, shape index: {}]  }
   0x1   :  { %10 = vsyncpa [#allocation7], 0 }
   0x2   :  { %11 = vsyncpa [#allocation5], 0  ;;  %s205_s12 = smov [#allocation3]   ;;  %s206_s14 = smov [#allocation6]  }
   0x3   :  { %s20_s13 = sshll.u32 %s205_s12, 4  ;;  %s30_s15 = sshll.u32 %s206_s14, 4  ;;  %s21_s13 = int_to_ptr.vmem [resolvable:$true] %s20_s13  ;;  %s31_s15 = int_to_ptr.vmem [resolvable:$true] %s30_s15 }
   0x4   :  { %s147_s16 = scalar_lea.vmem %s21_s13, 256  ;;  %p152_p1 = scmp.lt.s32.totalorder %s21_s13, %s21_s13 }
   0x5   :  { %p148_p0 = scmp.ne.s32.totalorder %s21_s13, %s147_s16  ;;  %p153_p2 = scmp.lt.s32.totalorder %s147_s16, %s147_s16 }
   0x7   :  { %p154_p3 = por %p153_p2, %p152_p1 }
   0x9   :  { %p155_p4 = pnand %p154_p3, %p148_p0 }
   0xb   :  { %158 = shalt.err (!%p155_p4)
}
   0xc   :  { %23 = dma.hbm_to_vmem [thread:$0]  %s242_s1, 256, %s21_s13, [#allocation4]  }
   0xd   :  { %s167_s19 = scalar_lea.vmem %s31_s15, 128  ;;  %p172_p6 = scmp.lt.s32.totalorder %s31_s15, %s31_s15 }
   0xe   :  { %p168_p5 = scmp.ne.s32.totalorder %s31_s15, %s167_s19  ;;  %p173_p7 = scmp.lt.s32.totalorder %s167_s19, %s167_s19 }
  0x10   :  { %p174_p8 = por %p173_p7, %p172_p6 }
  0x12   :  { %p175_p9 = pnand %p174_p8, %p168_p5 }
  0x14   :  { %178 = shalt.err (!%p175_p9)
}
  0x15   :  { %33 = dma.hbm_to_vmem [thread:$0]  %s243_s2, 128, %s31_s15, [#allocation7]  }
  0x16   :  { %199 = dma.done.wait [#allocation4], 256  }
  0x17   :  { %200 = vsyncadd [#allocation4], 4294967040 }
  0x18   :  { %201 = dma.done.wait [#allocation7], 128  }
  0x19   :  { %202 = vsyncadd [#allocation7], 4294967168  ;;  %v47_v0 = vlaneseq  ;;  %v207_v1 = vmov 1983009808   ;;  %v44_v4 = vstv %s241_s0  ;;  %v43_v10 = vld [vmem:[#allocation6] sm:$0xff]  ;;  %v41_v31 = vld [vmem:[#allocation3] sm:$0xff] }
  0x1a   :  { %v82_v2 = vunpack.c.l.s4 %v207_v1  ;;  %v45_v15 = vmul.f32 %v44_v4, %v43_v10  ;;  %v42_v35 = vld [vmem:[#allocation3 + $0x8] sm:$0xff]  ;;  %s208_s0 = smov [#allocation8]  }
  0x1b   :  { %v48_v3 = vshrl.u32 %v47_v0, 7  ;;  %s125_s2 = sshll.u32 %s208_s0, 4  ;;  %s126_s2 = int_to_ptr.vmem [resolvable:$true] %s125_s2 }
  0x1c   :  { %v83_v5 = vunpack.c.0.s8 %v82_v2  ;;  %s179_s23 = scalar_lea.vmem %s126_s2, 256  ;;  %p184_p11 = scmp.lt.s32.totalorder %s126_s2, %s126_s2 }
  0x1d   :  { %v49_v6 = vsub.s32 0, %v48_v3  ;;  %v53_v7 = vsub.s32 1, %v48_v3  ;;  %v57_v8 = vsub.s32 2, %v48_v3  ;;  %v61_v9 = vsub.s32 3, %v48_v3  ;;  %p180_p10 = scmp.ne.s32.totalorder %s126_s2, %s179_s23  ;;  %p185_p12 = scmp.lt.s32.totalorder %s179_s23, %s179_s23 }
  0x1e   :  { %v65_v11 = vsub.s32 4, %v48_v3  ;;  %v69_v12 = vsub.s32 5, %v48_v3  ;;  %v73_v13 = vsub.s32 6, %v48_v3  ;;  %v77_v14 = vsub.s32 7, %v48_v3 }
  0x1f   :  { %v86_v16 = vsub.s32 %v83_v5, %v48_v3  ;;  %v50_v17 = vrot.slane %v45_v15, %v49_v6  ;;  %v54_v18 = vrot.slane %v45_v15, %v53_v7  ;;  %v58_v19 = vrot.slane %v45_v15, %v57_v8  ;;  %p186_p13 = por %p185_p12, %p184_p11 }
  0x20   :  { %v62_v20 = vrot.slane %v45_v15, %v61_v9  ;;  %v66_v21 = vrot.slane %v45_v15, %v65_v11  ;;  %v70_v22 = vrot.slane %v45_v15, %v69_v12  ;;  %v74_v23 = vrot.slane %v45_v15, %v73_v13 }
  0x21   :  { %v78_v24 = vrot.slane %v45_v15, %v77_v14  ;;  %v79_v25 = vcombine.low %v50_v17, %v54_v18  ;;  %p187_p0 = pnand %p186_p13, %p180_p10 }
  0x22   :  { %v80_v26 = vcombine.low %v58_v19, %v62_v20  ;;  %v96_v27 = vcombine.low %v66_v21, %v70_v22 }
  0x23   :  { %v97_v28 = vcombine.low %v74_v23, %v78_v24  ;;  %v87_v29 = vrot.slane %v79_v25, %v86_v16 }
  0x24   :  { %v94_v30 = vrot.slane %v80_v26, %v86_v16  ;;  %v104_v32 = vrot.slane %v96_v27, %v86_v16 }
  0x25   :  { %v111_v33 = vrot.slane %v97_v28, %v86_v16 }
  0x26   :  { %v95_v34 = vcombine.low %v87_v29, %v94_v30 }
  0x27   :  { %v112_v36 = vcombine.low %v104_v32, %v111_v33 }
  0x28   :  { %v115_v37 = vsub.f32 %v41_v31, %v95_v34 }
  0x29   :  { %v116_v38 = vsub.f32 %v42_v35, %v112_v36 }
  0x2a   :  { %117 = vst [vmem:[#allocation8] sm:$0xff] %v115_v37 }
  0x2b   :  { %118 = vst [vmem:[#allocation8 + $0x8] sm:$0xff] %v116_v38 }
  0x2c   :  { %190 = shalt.err (!%p187_p0)
}
  0x2d   :  { %128 = dma.vmem_to_hbm [thread:$0]  %s126_s2, 256, %s244_s3, [#allocation5]  }
  0x2e   :  { %203 = dma.done.wait [#allocation5], 256  }
  0x2f   :  { %204 = vsyncadd [#allocation5], 4294967040 }
  0x30   :  { %132 = vsyncpa [#allocation4], 1 }
  0x31   :  { %133 = vsyncpa [#allocation7], 1 }
  0x32   :  { %134 = vsyncpa [#allocation5], 1 }

</bundles_post_ra>
